<compile_context>
chip_gen: v7x
topology: tpu7x:2x2x1
jax: 0.10.0
libtpu: 0.0.40
codegen_flags: <defaults>
</compile_context>

<pallas_src>
import functools
import numpy as np
import jax
import jax.numpy as jnp
from jax.experimental import pallas as pl
from jax.experimental.pallas import tpu as pltpu

EPS_F = 1e-12   # epsilon added to the Frobenius norm in g(F)
BN_EPS = 1e-5   # BatchNorm1d eps


# --------------------------- Pallas kernels ---------------------------

def _branch_solve_kernel(xp_ref, qs_ref, qf_ref, lamf_ref, lamsp_ref, t3_ref,
                         *, gamma, n_k):
    """Pass A (1-D grid over node-column tiles j):

         T2         = (Q_F^T X) @ Q_S[:, j]                  one (m, n) @ (n, tn) MXU dot
         T3_k[:, j] = Q_F @ (G_k ⊙ T2),  G_k = 1/(1 - gamma * lam_F * lam_S^k)
       All K scales of the Q_F matmul are fused into one (m, m) @ (m, K*tn) dot.
       Output T3 is scale-stacked on sublanes: (K*m, n) bf16, lane-dense stores.
    """
    m = qf_ref.shape[0]
    tn = qs_ref.shape[1]

    # (m, n) @ (n, tn) -> (m, tn); bf16 operands, f32 accumulation.
    t2 = jnp.dot(xp_ref[...], qs_ref[...], preferred_element_type=jnp.float32)

    gl = gamma * lamf_ref[...]              # (m, 1)  f32, hoisted out of the scale loop
    lam_s = lamsp_ref[...]                  # (K, tn) f32  (lam_S ** k per branch)
    qf = qf_ref[...]                        # (m, m)  bf16

    mks = []
    for k in range(n_k):                    # K is tiny & static -> unrolled
        g = pl.reciprocal(1.0 - gl * lam_s[k:k + 1, :], approx=False)   # exact: feeds features
        mks.append((g * t2).astype(qf.dtype))
    mk_all = jnp.concatenate(mks, axis=1)   # (m, K*tn) bf16, scales along lanes

    z_all = jnp.dot(qf, mk_all, preferred_element_type=jnp.float32)     # (m, K*tn) f32
    for k in range(n_k):
        t3_ref[k * m:(k + 1) * m, :] = z_all[:, k * tn:(k + 1) * tn].astype(t3_ref.dtype)


def _att_head_kernel(t3_ref, qst_ref, w1_ref, b1_ref, v_ref,
                     scale_ref, shift_ref, b_ref, out_ref, *, n_k):
    """Pass B (1-D grid over node-column tiles j). T3 (K*m, n) stays VMEM-resident:

         Z_all[:, j] = T3 @ Q_S^T[:, j]               one (K*m, n) @ (n, tn) MXU dot
         beta        = softmax_k( v^T tanh(W1 Z_k + b1) )   (attention over scales)
         H           = (sum_k beta_k ⊙ Z_k) * bn_scale + bn_shift   (BatchNorm1d eval, folded)
         out^T[:, j] = B @ H                          lane-dense (m_y, tn) store
    """
    m = w1_ref.shape[1]

    z_all = jnp.dot(t3_ref[...], qst_ref[...], preferred_element_type=jnp.float32)
    zs = [z_all[k * m:(k + 1) * m, :] for k in range(n_k)]          # each (m, tn) f32

    w1 = w1_ref[...]                        # (h, m) f32
    b1 = b1_ref[...]                        # (h, 1) f32
    v = v_ref[...]                          # (h, 1) f32

    # Attention logits per scale, per node column.
    logits = []
    for z_k in zs:
        a = jnp.tanh(jnp.dot(w1, z_k, preferred_element_type=jnp.float32) + b1)
        logits.append(jnp.sum(a * v, axis=0, keepdims=True))        # (1, tn)

    # Softmax over the K scales (K is tiny & static; no concatenate needed).
    w_max = logits[0]
    for l in logits[1:]:
        w_max = jnp.maximum(w_max, l)
    exps = [jnp.exp(l - w_max) for l in logits]
    denom = exps[0]
    for e in exps[1:]:
        denom = denom + e
    inv = pl.reciprocal(denom, approx=True)                          # (1, tn)

    h = zs[0] * (exps[0] * inv)
    for k in range(1, n_k):
        h = h + zs[k] * (exps[k] * inv)

    # BatchNorm1d (eval mode) folded into scale/shift; dropout = identity in eval.
    h = h * scale_ref[...] + shift_ref[...]                          # (m, tn)
    out_ref[...] = jnp.dot(b_ref[...], h,
                           preferred_element_type=jnp.float32).astype(out_ref.dtype)


# --------------------------- wrapper ---------------------------

def _pick_node_tile(n, tn_req):
    """Node-column tile: multiple of 128, divides n, and keeps >= 2 parallel tiles
       (v7x has 2 TensorCores) whenever n allows it."""
    tn = max(128, min(int(tn_req), n))
    if n >= 256 and n // tn < 2:
        tn = n // 2
    tn = max(128, (tn // 128) * 128)
    while n % tn != 0:
        tn -= 128
    return tn


def mgnni_m_att_forward(X, F_param, B_param, att_w1, att_b1, att_v,
                        bn_w, bn_b, bn_mean, bn_var,
                        Q_S, lam_S, ks, gamma, *, tn=512):
    """Eval-mode forward of MGNNI_m_att. X is (m, n) = (features, nodes); returns (n, m_y)."""
    m, n = X.shape
    m_y = B_param.shape[0]
    h_att = att_w1.shape[0]
    K = len(ks)
    assert n % 128 == 0 and m % 8 == 0, "node count must be a multiple of 128, features of 8"

    tn = _pick_node_tile(n, tn)

    # ---- g(F) + eigendecomposition (tiny; HIGHEST precision since it feeds eigh) ----
    FtF = jnp.dot(F_param.T, F_param, precision=jax.lax.Precision.HIGHEST)
    SF = FtF / (jnp.linalg.norm(FtF) + EPS_F)
    # TODO(synk): symmetric eigendecomposition has no Pallas TPU equivalent; done in plain XLA.
    lam_F, Q_F = jnp.linalg.eigh(SF)

    # Eigenvalues of S^k for every scale k (MGNNI_m_iter's iterative fixed-point solve is
    # replaced by the equivalent closed-form spectral solution of Z = gamma g(F) Z S^k + X).
    lam_S_pows = jnp.stack([lam_S ** int(k) for k in ks], axis=0)          # (K, n) f32

    # Fold eval-mode BatchNorm1d into per-feature scale / shift (f32).
    bn_scale = bn_w * jax.lax.rsqrt(bn_var + BN_EPS)
    bn_shift = bn_b - bn_mean * bn_scale

    # bf16 operands for the MXU-heavy matmuls (f32 accumulation inside the kernels).
    qs_bf = Q_S.astype(jnp.bfloat16)                                       # (n, n)
    qst_bf = Q_S.T.astype(jnp.bfloat16)                                    # (n, n) pre-transposed
    qf_bf = Q_F.astype(jnp.bfloat16)                                       # (m, m)
    xp_bf = jnp.dot(Q_F.T, X,
                    precision=jax.lax.Precision.HIGHEST).astype(jnp.bfloat16)   # (m, n)

    grid = (n // tn,)   # node-column tiles only; reduction axes collapsed (operands resident)

    # VMEM budget (assume double-buffering of every block); raise the scoped limit to fit,
    # capped so the same shapes also fit v7x's 64 MiB per-core VMEM with headroom.
    bytes_a = 2 * (m * n * 2 + n * tn * 2 + K * m * tn * 2) + m * m * 2 + (m + K * tn) * 4
    bytes_b = (2 * (K * m * n * 2 + n * tn * 2 + m_y * tn * 4)
               + (h_att * m + 2 * h_att + 2 * m + m_y * m) * 4)
    vmem_limit = int(min(100 * 2**20, max(32 * 2**20, 2 * max(bytes_a, bytes_b))))
    cparams = pltpu.CompilerParams(
        dimension_semantics=("parallel",),
        vmem_limit_bytes=vmem_limit)

    # ---- pass A: T3_k = Q_F (G_k ⊙ ((Q_F^T X) Q_S)) for every scale, tiled over node columns ----
    ce_a = pl.CostEstimate(
        flops=2 * m * n * n + 2 * K * m * m * n,
        transcendentals=K * m * n,
        bytes_accessed=2 * m * n + 2 * n * n + 2 * K * m * n)
    t3 = pl.pallas_call(
        functools.partial(_branch_solve_kernel, gamma=float(gamma), n_k=K),
        grid=grid,
        in_specs=[
            pl.BlockSpec((m, n), lambda j: (0, 0)),          # Q_F^T X   (VMEM-resident)
            pl.BlockSpec((n, tn), lambda j: (0, j)),         # Q_S column slab
            pl.BlockSpec((m, m), lambda j: (0, 0)),          # Q_F
            pl.BlockSpec((m, 1), lambda j: (0, 0)),          # lam_F
            pl.BlockSpec((K, tn), lambda j: (0, j)),         # lam_S ** k per scale
        ],
        out_specs=pl.BlockSpec((K * m, tn), lambda j: (0, j)),
        out_shape=jax.ShapeDtypeStruct((K * m, n), jnp.bfloat16),
        compiler_params=cparams,
        cost_estimate=ce_a,
    )(xp_bf, qs_bf, qf_bf, lam_F.reshape(m, 1), lam_S_pows)

    # ---- pass B: Z_k = T3_k Q_S^T, attention over scales, BN, linear head (fused) ----
    ce_b = pl.CostEstimate(
        flops=2 * K * m * n * n + 2 * K * h_att * m * n + 2 * m_y * m * n,
        transcendentals=K * (h_att + 2) * n,
        bytes_accessed=2 * K * m * n + 2 * n * n + 4 * m_y * n)
    out_t = pl.pallas_call(
        functools.partial(_att_head_kernel, n_k=K),
        grid=grid,
        in_specs=[
            pl.BlockSpec((K * m, n), lambda j: (0, 0)),      # T3       (VMEM-resident)
            pl.BlockSpec((n, tn), lambda j: (0, j)),         # Q_S^T column slab (pre-transposed)
            pl.BlockSpec((h_att, m), lambda j: (0, 0)),      # attention W1
            pl.BlockSpec((h_att, 1), lambda j: (0, 0)),      # attention b1
            pl.BlockSpec((h_att, 1), lambda j: (0, 0)),      # attention v
            pl.BlockSpec((m, 1), lambda j: (0, 0)),          # BN scale (folded)
            pl.BlockSpec((m, 1), lambda j: (0, 0)),          # BN shift (folded)
            pl.BlockSpec((m_y, m), lambda j: (0, 0)),        # B
        ],
        out_specs=pl.BlockSpec((m_y, tn), lambda j: (0, j)),
        out_shape=jax.ShapeDtypeStruct((m_y, n), jnp.float32),
        compiler_params=cparams,
        cost_estimate=ce_b,
    )(t3, qst_bf, att_w1, att_b1.reshape(h_att, 1), att_v.reshape(h_att, 1),
      bn_scale.reshape(m, 1), bn_shift.reshape(m, 1), B_param)

    return out_t.T            # (n, m_y), matching the PyTorch module output


# --------------------------- demo / check ---------------------------

if __name__ == "__main__":
    m, n, m_y, h_att = 32, 256, 8, 16      # hidden features, nodes, classes, attention hidden
    ks = (1, 2)                            # multiscale propagation orders
    gamma = 0.8

    key = jax.random.PRNGKey(0)
    k_adj, k_F, k_B, k_X, k_w1, k_b1, k_v, k_bn = jax.random.split(key, 8)

    # Symmetric normalized adjacency S = D^{-1/2}(A+I)D^{-1/2} (graph setup).
    A = (jax.random.uniform(k_adj, (n, n)) < 0.05).astype(jnp.float32)
    A = jnp.maximum(A, A.T) + jnp.eye(n, dtype=jnp.float32)
    dinv = 1.0 / jnp.sqrt(jnp.sum(A, axis=1))
    S = dinv[:, None] * A * dinv[None, :]
    # TODO(synk): eigh(S) is precomputed spectral setup; eigh has no Pallas equivalent.
    lam_S, Q_S = jnp.linalg.eigh(S)

    # Parameters (deterministic synthetic init, matching module shapes).
    F_param = (1.0 / np.sqrt(m)) * jax.random.normal(k_F, (m, m), jnp.float32)
    B_param = (1.0 / np.sqrt(m)) * jax.random.normal(k_B, (m_y, m), jnp.float32)
    att_w1 = (1.0 / np.sqrt(m)) * jax.random.normal(k_w1, (h_att, m), jnp.float32)
    att_b1 = 0.1 * jax.random.normal(k_b1, (h_att,), jnp.float32)
    att_v = (1.0 / np.sqrt(h_att)) * jax.random.normal(k_v, (1, h_att), jnp.float32)
    kb1, kb2, kb3, kb4 = jax.random.split(k_bn, 4)
    bn_w = 1.0 + 0.1 * jax.random.normal(kb1, (m,), jnp.float32)
    bn_b = 0.1 * jax.random.normal(kb2, (m,), jnp.float32)
    bn_mean = 0.1 * jax.random.normal(kb3, (m,), jnp.float32)
    bn_var = 1.0 + 0.25 * jax.random.uniform(kb4, (m,), jnp.float32)

    # Input: X is (m, n) = (features, nodes), as in MGNNI.
    X = jax.random.normal(k_X, (m, n), jnp.float32)

    out = mgnni_m_att_forward(X, F_param, B_param, att_w1, att_b1, att_v,
                              bn_w, bn_b, bn_mean, bn_var,
                              Q_S, lam_S, ks, gamma)
    out = jax.block_until_ready(out)
    assert out.shape == (n, m_y)

    # Pure-numpy (float64) reference of the same eval-mode forward.
    Xd = np.asarray(X, np.float64)
    Fd = np.asarray(F_param, np.float64)
    Bd = np.asarray(B_param, np.float64)
    Sd = np.asarray(S, np.float64)
    W1d = np.asarray(att_w1, np.float64)
    b1d = np.asarray(att_b1, np.float64)
    vd = np.asarray(att_v, np.float64)
    bnw, bnb = np.asarray(bn_w, np.float64), np.asarray(bn_b, np.float64)
    bnm, bnv = np.asarray(bn_mean, np.float64), np.asarray(bn_var, np.float64)

    FtF = Fd.T @ Fd
    SFd = FtF / (np.linalg.norm(FtF) + EPS_F)
    lFd, QFd = np.linalg.eigh(SFd)
    lSd, QSd = np.linalg.eigh(Sd)
    branch_outs = []
    for kpow in ks:
        G = 1.0 / (1.0 - gamma * lFd[:, None] * (lSd ** kpow)[None, :])    # (m, n)
        Z = QFd @ (G * (QFd.T @ Xd @ QSd)) @ QSd.T                         # (m, n)
        branch_outs.append(Z.T)                                            # (n, m)
    stack = np.stack(branch_outs, axis=1)                                  # (n, K, m)
    w = np.tanh(stack @ W1d.T + b1d) @ vd.T                                # (n, K, 1)
    w = w - w.max(axis=1, keepdims=True)
    beta = np.exp(w)
    beta = beta / beta.sum(axis=1, keepdims=True)
    agg = (stack * beta).sum(axis=1)                                       # (n, m)
    Hn = (agg - bnm) / np.sqrt(bnv + BN_EPS) * bnw + bnb                   # BN eval, dropout=id
    ref = Hn @ Bd.T                                                        # (n, m_y)

    # bf16 MXU matmuls with f32 accumulation -> lenient tolerance vs the f64 reference.
    np.testing.assert_allclose(np.asarray(out, np.float64), ref, rtol=1e-1, atol=1e-1)

    print("KERNEL_OK")
</pallas_src>

<mosaic_0001>
module attributes {stable_mosaic.version = 11 : i64} {
  func.func @_branch_solve_kernel(%arg0: i32, %arg1: memref<32x256xbf16, #tpu.memory_space<vmem>>, %arg2: memref<256x128xbf16, #tpu.memory_space<vmem>>, %arg3: memref<32x32xbf16, #tpu.memory_space<vmem>>, %arg4: memref<32x1xf32, #tpu.memory_space<vmem>>, %arg5: memref<2x128xf32, #tpu.memory_space<vmem>>, %arg6: memref<64x128xbf16, #tpu.memory_space<vmem>>) attributes {dimension_semantics = [#tpu.dimension_semantics<parallel>], iteration_bounds = array<i64: 2>, scalar_prefetch = 0 : i64, scratch_operands = 0 : i64, tpu.core_type = #tpu.core_type<tc>, window_params = [{pipeline_mode = #tpu.pipeline_mode<synchronous>, transform_indices = @transform_0, window_bounds = array<i64: 32, 256>}, {transform_indices = @transform_1, window_bounds = array<i64: 256, 128>}, {pipeline_mode = #tpu.pipeline_mode<synchronous>, transform_indices = @transform_2, window_bounds = array<i64: 32, 32>}, {pipeline_mode = #tpu.pipeline_mode<synchronous>, transform_indices = @transform_3, window_bounds = array<i64: 32, 1>}, {transform_indices = @transform_4, window_bounds = array<i64: 2, 128>}, {transform_indices = @transform_5, window_bounds = array<i64: 64, 128>}]} {
    %c0 = arith.constant 0 : index
    %c0_0 = arith.constant 0 : index
    %0 = vector.load %arg1[%c0, %c0_0] : memref<32x256xbf16, #tpu.memory_space<vmem>>, vector<32x256xbf16>
    %c0_1 = arith.constant 0 : index
    %c0_2 = arith.constant 0 : index
    %1 = vector.load %arg2[%c0_1, %c0_2] : memref<256x128xbf16, #tpu.memory_space<vmem>>, vector<256x128xbf16>
    %cst = arith.constant dense<0.000000e+00> : vector<32x128xf32>
    %2 = tpu.matmul %0, %1, %cst {dimension_numbers = #tpu.dot_dimension_numbers<[1], [0], [0], [1], [0, 0, 1, 1], [], []>} : vector<32x256xbf16>, vector<256x128xbf16>, vector<32x128xf32> -> vector<32x128xf32>
    %c0_3 = arith.constant 0 : index
    %c0_4 = arith.constant 0 : index
    %3 = vector.load %arg4[%c0_3, %c0_4] : memref<32x1xf32, #tpu.memory_space<vmem>>, vector<32x1xf32>
    %cst_5 = arith.constant 8.000000e-01 : f32
    %4 = vector.broadcast %cst_5 : f32 to vector<32x1xf32>
    %5 = arith.mulf %4, %3 : vector<32x1xf32>
    %c0_6 = arith.constant 0 : index
    %c0_7 = arith.constant 0 : index
    %6 = vector.load %arg5[%c0_6, %c0_7] : memref<2x128xf32, #tpu.memory_space<vmem>>, vector<2x128xf32>
    %c0_8 = arith.constant 0 : index
    %c0_9 = arith.constant 0 : index
    %7 = vector.load %arg3[%c0_8, %c0_9] : memref<32x32xbf16, #tpu.memory_space<vmem>>, vector<32x32xbf16>
    %8 = vector.extract_strided_slice %6 {offsets = [0, 0], sizes = [1, 128], strides = [1, 1]} : vector<2x128xf32> to vector<1x128xf32>
    %9 = vector.broadcast %5 : vector<32x1xf32> to vector<32x128xf32>
    %10 = vector.broadcast %8 : vector<1x128xf32> to vector<32x128xf32>
    %11 = arith.mulf %9, %10 : vector<32x128xf32>
    %cst_10 = arith.constant 1.000000e+00 : f32
    %12 = vector.broadcast %cst_10 : f32 to vector<32x128xf32>
    %13 = arith.subf %12, %11 : vector<32x128xf32>
    %14 = tpu.reciprocal %13 : vector<32x128xf32> -> vector<32x128xf32>
    %15 = arith.mulf %14, %2 : vector<32x128xf32>
    %16 = arith.truncf %15 : vector<32x128xf32> to vector<32x128xbf16>
    %17 = vector.extract_strided_slice %6 {offsets = [1, 0], sizes = [1, 128], strides = [1, 1]} : vector<2x128xf32> to vector<1x128xf32>
    %18 = vector.broadcast %5 : vector<32x1xf32> to vector<32x128xf32>
    %19 = vector.broadcast %17 : vector<1x128xf32> to vector<32x128xf32>
    %20 = arith.mulf %18, %19 : vector<32x128xf32>
    %cst_11 = arith.constant 1.000000e+00 : f32
    %21 = vector.broadcast %cst_11 : f32 to vector<32x128xf32>
    %22 = arith.subf %21, %20 : vector<32x128xf32>
    %23 = tpu.reciprocal %22 : vector<32x128xf32> -> vector<32x128xf32>
    %24 = arith.mulf %23, %2 : vector<32x128xf32>
    %25 = arith.truncf %24 : vector<32x128xf32> to vector<32x128xbf16>
    %26 = tpu.concatenate %16, %25 in 1 : vector<32x128xbf16>, vector<32x128xbf16> -> vector<32x256xbf16>
    %cst_12 = arith.constant dense<0.000000e+00> : vector<32x256xf32>
    %27 = tpu.matmul %7, %26, %cst_12 {dimension_numbers = #tpu.dot_dimension_numbers<[1], [0], [0], [1], [0, 0, 1, 1], [], []>} : vector<32x32xbf16>, vector<32x256xbf16>, vector<32x256xf32> -> vector<32x256xf32>
    %28 = vector.extract_strided_slice %27 {offsets = [0, 0], sizes = [32, 128], strides = [1, 1]} : vector<32x256xf32> to vector<32x128xf32>
    %29 = arith.truncf %28 : vector<32x128xf32> to vector<32x128xbf16>
    %c0_13 = arith.constant 0 : index
    %c0_14 = arith.constant 0 : index
    %30 = vector.load %arg6[%c0_13, %c0_14] : memref<64x128xbf16, #tpu.memory_space<vmem>>, vector<32x128xbf16>
    tpu.vector_store %arg6[%c0_13, %c0_14], %29 {strides = array<i32>} : memref<64x128xbf16, #tpu.memory_space<vmem>>, vector<32x128xbf16>,
    %31 = vector.extract_strided_slice %27 {offsets = [0, 128], sizes = [32, 128], strides = [1, 1]} : vector<32x256xf32> to vector<32x128xf32>
    %32 = arith.truncf %31 : vector<32x128xf32> to vector<32x128xbf16>
    %c32 = arith.constant 32 : index
    %c0_15 = arith.constant 0 : index
    %33 = vector.load %arg6[%c32, %c0_15] : memref<64x128xbf16, #tpu.memory_space<vmem>>, vector<32x128xbf16>
    tpu.vector_store %arg6[%c32, %c0_15], %32 {strides = array<i32>} : memref<64x128xbf16, #tpu.memory_space<vmem>>, vector<32x128xbf16>,
    return
  }
  func.func @transform_0(%arg0: i32) -> (i32, i32) {
    %c0_i32 = arith.constant 0 : i32
    %c0_i32_0 = arith.constant 0 : i32
    %c0_i32_1 = arith.constant 0 : i32
    return %c0_i32, %c0_i32_0 : i32, i32
  }
  func.func @transform_1(%arg0: i32) -> (i32, i32) {
    %c0_i32 = arith.constant 0 : i32
    %c0_i32_0 = arith.constant 0 : i32
    return %c0_i32, %arg0 : i32, i32
  }
  func.func @transform_2(%arg0: i32) -> (i32, i32) {
    %c0_i32 = arith.constant 0 : i32
    %c0_i32_0 = arith.constant 0 : i32
    %c0_i32_1 = arith.constant 0 : i32
    return %c0_i32, %c0_i32_0 : i32, i32
  }
  func.func @transform_3(%arg0: i32) -> (i32, i32) {
    %c0_i32 = arith.constant 0 : i32
    %c0_i32_0 = arith.constant 0 : i32
    %c0_i32_1 = arith.constant 0 : i32
    return %c0_i32, %c0_i32_0 : i32, i32
  }
  func.func @transform_4(%arg0: i32) -> (i32, i32) {
    %c0_i32 = arith.constant 0 : i32
    %c0_i32_0 = arith.constant 0 : i32
    return %c0_i32, %arg0 : i32, i32
  }
  func.func @transform_5(%arg0: i32) -> (i32, i32) {
    %c0_i32 = arith.constant 0 : i32
    %c0_i32_0 = arith.constant 0 : i32
    return %c0_i32, %arg0 : i32, i32
  }
}

</mosaic_0001>

<bundles_post_ra>
// kernel: tpu_custom_call.1
= control target key start
LH: loop header
LB: loop body
LE: loop exit
PB: predicated region body
PF: predicated region fallthrough
CT: control target
= control target key end

     0   :  { %10 = vsyncpa [#allocation3], 0  ;;  %s1410_s0 = inlined_call_operand.vmem [shape: bf16[32,256], index: 0, kind: input, shape index: {}]   ;;  %s1411_s1 = inlined_call_operand.hbm [shape: bf16[256,256], index: 1, kind: input, shape index: {}]   ;;  %s1412_s2 = inlined_call_operand.hbm [shape: bf16[32,32], index: 2, kind: input, shape index: {}]   ;;  %s1413_s3 = inlined_call_operand.vmem [shape: f32[32,1], index: 3, kind: input, shape index: {}]   ;;  %s1414_s4 = inlined_call_operand.vmem [shape: f32[2,256], index: 4, kind: input, shape index: {}]   ;;  %s1415_s5 = inlined_call_operand.hbm [shape: bf16[64,256], index: 5, kind: output, shape index: {}]  }
   0x1   :  { %12 = vsyncpa [#allocation3 + $0x1], 0 }
   0x2   :  { %13 = vsyncpa [#allocation6], 0 }
   0x3   :  { %14 = vsyncpa [#allocation4], 0 }
   0x4   :  { %16 = vsyncpa [#allocation4 + $0x1], 0  ;;  %s1153_s18 = smov 0   ;;  %s1155_s19 = smov 0  }
   0x5   :  { %s1157_s20 = smov 0   ;;  %s1159_s21 = smov 0  }
   0x6 LB: > { %s1174_s22 = sadd.s32 4294967295, %s1111_s21   ;;  %s771_s23 = sadd.s32 4294967294, %s1111_s21   ;;  %s1111_s21 = sphi %s1159_s21, %s1441_s21   ;;  %s1107_s20 = sphi %s1157_s20, %s1440_s20   ;;  %s1103_s19 = sphi %s1155_s19, %s1439_s19   ;;  %s1099_s18 = sphi %s1153_s18, %s1438_s18  }
   0x7   : > { %s1178_s24 = sadd.s32 1, %s1111_s21   ;;  %s50_s25 = sadd.s32 1, %s1107_s20 }
   0x8   : > { %s47_s26 = ssub.s32 %s1111_s21, %s1178_s24  ;;  %p57_p0 = scmp.ne.s32.totalorder %s1107_s20, %s1103_s19 }
   0x9   : > { %p48_p1 = scmp.eq.s32.totalorder %s47_s26, 0  ;;  %p58_p2 = scmp.eq.s32.totalorder %s1111_s21, 0 }
   0xa   : > { %p63_p3 = scmp.ne.s32.totalorder %s1103_s19, %s1099_s18  ;;  %p1416_p4 = scmp.eq.s32.totalorder %s1174_s22, 0 }
   0xb   : > { %s1190_s27 = scalar_select %p48_p1, %s1107_s20, %s50_s25  }
   0xc   : > { %p1192_p5 = por %p58_p2, %p57_p0  ;;  %p1198_p6 = por %p1416_p4, %p63_p3 }
   0xd   : > { %p155_p7 = scmp.eq.s32.totalorder %s1174_s22, 1  ;;  %p161_p8 = scmp.eq.s32.totalorder %s771_s23, 1 }
   0xe   : > { %s1421_s28 = scalar_select %p1192_p5, 1, 0 }
   0xf   : > { %s1422_s29 = scalar_select %p1198_p6, 1, 0 }
  0x10   : > { %p772_p9 = scmp.ge.s32.totalorder %s1111_s21, 1  ;;  %p168_p10 = scmp.lt.s32.totalorder %s1111_s21, 3 }
  0x11   : > { %p1205_p11 = por %p155_p7, %p57_p0  ;;  %p1209_p12 = por %p161_p8, %p63_p3 }
  0x12   : > { %p1213_p13 = pnand %p772_p9, %p168_p10  ;;  %s1113_s8 = smov [#allocation5]  }
  0x13   : > { %s1423_s30 = scalar_select %p1205_p11, 1, 0 }
  0x14   : > { %s1424_s6 = scalar_select %p1209_p12, 1, 0 }
  0x15   : > { %s1425_s7 = scalar_select %p1213_p13, 1, 0 }
  0x16   : > { %p885_p1 = pneg %p1213_p13  ;;  %s183_s9 = sshll.u32 %s1113_s8, 4  ;;  %s184_s9 = int_to_ptr.vmem [resolvable:$true] %s183_s9 }
  0x17   : > { %s200_s11 = sand.u32 1, %s1107_s20   ;;  %s983_s14 = scalar_lea.hbm %s1412_s2, 256 }
  0x18   : > { %p1221_p2 = pnand %p885_p1, %p1416_p4  ;;  %p984_p7 = scmp.ne.s32.totalorder %s1412_s2, %s983_s14 }
  0x19   : > { %p990_p1 = scmp.lt.u32.totalorder %s983_s14, %s1412_s2 }
  0x1a   : > { %p985_p8 = pneg %p1221_p2 }
  0x1c   : > { %p986_p9 = pnand %p985_p8, %p984_p7 }
  0x1e   : > { %p987_p10 = pneg %p986_p9 }
  0x20   : > { %p992_p4 = pnand %p990_p1, %p987_p10 }
  0x22   : > { %995 = shalt.err (!%p992_p4)
}
  0x23   : > { %s996_s25 = scalar_lea.vmem %s184_s9, 256  ;;  %p1004_p11 = scmp.lt.s32.totalorder %s184_s9, %s184_s9 }
  0x24   : > { %p997_p0 = scmp.ne.s32.totalorder %s184_s9, %s996_s25  ;;  %p1005_p6 = scmp.lt.s32.totalorder %s996_s25, %s996_s25 }
  0x26   : > { %p999_p3 = pnand %p997_p0, %p985_p8  ;;  %p1006_p13 = por %p1005_p6, %p1004_p11 }
  0x28   : > { %p1000_p12 = pneg %p999_p3 }
  0x2a   : > { %p1007_p5 = pnand %p1006_p13, %p1000_p12 }
  0x2c   : > { %1010 = shalt.err (!%p1007_p5)
}
  0x2d   : > { %s1420_s26 = smov 64   ;;  %s1115_s8 = smov 4  }
  0x2e   : > { %888 = dma.hbm_to_vmem [thread:$0]  (!%p1221_p2), %s1412_s2, 256, %s184_s9, [#allocation6], %s1420_s26, %s1420_s26, %s1115_s8  }
  0x2f   : > { %p1427_p4 = scmp.ne.s32.totalorder %s1421_s28, 0  ;;  %p1428_p0 = scmp.lt.s32.totalorder %s1111_s21, 2 }
  0x30   : > { %s775_s15 = sshll.u32 %s200_s11, 7  ;;  %s776_s16 = sshll.u32 %s1111_s21, 6 }
  0x31   : > { %p1251_p3 = pnand %p1428_p0, %p1427_p4  ;;  %s1259_s10 = scalar_lea.hbm %s1411_s1, %s776_s16 }
  0x32   : > { %s204_s9 = scalar_lea.vmem [#allocation2], %s775_s15  ;;  %s1263_s25 = scalar_lea.sflag [#allocation3], %s200_s11 }
  0x33   : > { %s210_s28 = sshll.u32 %s204_s9, 4  ;;  %s1011_s12 = scalar_lea.hbm %s1259_s10, 2048  ;;  %s1261_s28 = int_to_ptr.vmem [resolvable:$true] %s210_s28 }
  0x34   : > { %p1012_p5 = scmp.ne.s32.totalorder %s1259_s10, %s1011_s12  ;;  %p1013_p6 = pneg %p1251_p3 }
  0x35   : > { %s1016_s17 = scalar_lea.hbm %s1411_s1, 4096  ;;  %p1017_p13 = scmp.lt.u32.totalorder %s1259_s10, %s1411_s1 }
  0x36   : > { %p1014_p11 = pnand %p1013_p6, %p1012_p5  ;;  %p1018_p2 = scmp.lt.u32.totalorder %s1016_s17, %s1011_s12 }
  0x37   : > { %p1020_p8 = scmp.lt.u32.totalorder %s1011_s12, %s1259_s10 }
  0x38   : > { %p1015_p12 = pneg %p1014_p11  ;;  %p1019_p7 = por %p1018_p2, %p1017_p13 }
  0x3a   : > { %p1021_p9 = por %p1020_p8, %p1019_p7 }
  0x3c   : > { %p1022_p10 = pnand %p1021_p9, %p1015_p12 }
  0x3e   : > { %1025 = shalt.err (!%p1022_p10)
}
  0x3f   : > { %s1026_s11 = scalar_lea.vmem %s1261_s28, 2048  ;;  %s1116_s15 = smov [#allocation2]  }
  0x40   : > { %p1027_p1 = scmp.ne.s32.totalorder %s1261_s28, %s1026_s11  ;;  %s1031_s9 = sshll.u32 %s1116_s15, 4  ;;  %s1032_s9 = int_to_ptr.vmem [resolvable:$false] %s1031_s9 }
  0x41   : > { %s1033_s26 = scalar_lea.vmem %s1032_s9, 4096  ;;  %p1034_p5 = scmp.lt.s32.totalorder %s1261_s28, %s1032_s9 }
  0x42   : > { %p1029_p4 = pnand %p1027_p1, %p1013_p6  ;;  %p1035_p11 = scmp.lt.s32.totalorder %s1033_s26, %s1026_s11 }
  0x44   : > { %p1030_p0 = pneg %p1029_p4  ;;  %p1036_p13 = por %p1035_p11, %p1034_p5 }
  0x46   : > { %p1037_p2 = pnand %p1036_p13, %p1030_p0 }
  0x48   : > { %1040 = shalt.err (!%p1037_p2)
}
  0x49   : > { %s1117_s12 = smov 128   ;;  %s1430_s13 = smov 64  }
  0x4a   : > { %892 = dma.hbm_to_vmem [thread:$0]  (!%p1251_p3), %s1259_s10, 2048, %s1261_s28, %s1263_s25, %s1117_s12, %s1430_s13, %s1115_s8  }
  0x4b   : > { %p1431_p6 = scmp.ne.s32.totalorder %s1425_s7, 0 }
  0x4c   : > { %s1296_s16 = sand.u32 (!%p1431_p6), 1, %s1103_s19   ;;  %p1432_p12 = scmp.ne.s32.totalorder (!%p1431_p6), %s1422_s29, 0 }
  0x4d   : > { %229 = sbr.rel (%p1431_p6) target bundleno = 596 (0x254), region = 40  ;;  %s778_s17 = sshll.u32 (!%p1431_p6), %s1296_s16, 7 }
  0x4e   : > { %s232_s23 = scalar_lea.sflag (!%p1431_p6), [#allocation3], %s1296_s16  ;;  %s1300_s11 = scalar_lea.vmem (!%p1431_p6), [#allocation2], %s778_s17 }
  0x54   : > { %1086 = dma.done.wait (%p1432_p12), %s232_s23, 2048  }
  0x55   : > { %1088 = vsyncadd (%p1432_p12), %s232_s23, 4294965248  ;;  %p1433_p3 = scmp.eq.s32.totalorder %s1174_s22, 0 }
  0x57   : > { %1090 = dma.done.wait (%p1433_p3), [#allocation6], 256   ;;  %p1434_p7 = pmov %p1433_p3 }
  0x58   : > { %v1118_v0 = vmov 0   ;;  %v943_v1 = vld [vmem:[%s1300_s11 + $0x40] sm:$0xff]   ;;  %v945_v3 = vld [vmem:[%s1300_s11 + $0x48] sm:$0xff]   ;;  %v947_v5 = vld [vmem:[%s1300_s11 + $0x50] sm:$0xff]   ;;  %p270_p8 = scmp.lt.s32.totalorder %s1174_s22, 1  ;;  %v509_v29 = vlaneseq  ;;  %vm563_vm0 = vcmask 261120  }
  0x59   : > { %1092 = vsyncadd (%p1434_p7), [#allocation6], 4294967040  ;;  %941 = vset.pattern.permute.xlu0 %v1118_v0  ;;  %942 = vset.pattern.permute.xlu1 %v1118_v0  ;;  %v944_v2 = vld [vmem:[%s1300_s11] sm:$0xff]   ;;  %v946_v4 = vld [vmem:[%s1300_s11 + $0x8] sm:$0xff]   ;;  %s780_s25 = sshll.u32 %s1296_s16, 5  ;;  %s815_s26 = sshll.u32 %s1174_s22, 6 }
  0x5a   : > { %602 = vmatprep.mubr.bf16.mxu1 %v1118_v0  ;;  %849 = vmatprep.subr.bf16.mxu0 %v943_v1  ;;  %v948_v6 = vld [vmem:[%s1300_s11 + $0x10] sm:$0xff]   ;;  %v949_v7 = vld [vmem:[%s1300_s11 + $0x58] sm:$0xff]   ;;  %v951_v9 = vld [vmem:[%s1300_s11 + $0x60] sm:$0xff]   ;;  %s271_s8 = scalar_select %p270_p8, %s1174_s22, 1  ;;  %v510_v30 = vshrl.u32 %v509_v29, 7 }
  0x5b   : > { %850 = vmatpush3.bf16.msra.mxu0 %v944_v2  ;;  %v950_v8 = vld [vmem:[%s1300_s11 + $0x18] sm:$0xff]   ;;  %v952_v10 = vld [vmem:[%s1300_s11 + $0x20] sm:$0xff]   ;;  %v953_v11 = vld [vmem:[%s1300_s11 + $0x68] sm:$0xff]   ;;  %s269_s15 = scalar_lea.vmem [#allocation7], %s780_s25  ;;  %s1366_s17 = scalar_lea.hbm %s1415_s5, %s815_s26 }
  0x5c   : > { %851 = vmatprep.subr.bf16.mxu0 %v945_v3  ;;  %v961_v12 = vld [vmem:[%s1410_s0 + $0x4] ss:$8 sps:$4 sm:$0xff]   ;;  %v478_v16 = vld [vmem:[%s1413_s3 + $0x10] sm:$0xff]  ;;  %v479_v18 = vld [vmem:[%s1413_s3 + $0x18] sm:$0xff]  ;;  %v511_v31 = vsub.s32 0, %v510_v30  ;;  %v533_v33 = vsub.s32 1, %v510_v30 }
  0x5d   : > { %v954_v13 = vld [vmem:[%s1300_s11 + $0x28] sm:$0xff]   ;;  %v476_v14 = vld [vmem:[%s1413_s3] sm:$0xff]  ;;  %459 = vmatprep.mubr.bf16.mxu0 %v961_v12  ;;  %v955_v19 = vld [vmem:[%s1300_s11 + $0x70] sm:$0xff]   ;;  %v482_v20 = vmul.f32 0.8, %v478_v16  ;;  %s676_s9 = sshll.u32 %s269_s15, 4  ;;  %s1361_s9 = int_to_ptr.vmem [resolvable:$true] %s676_s9 }
  0x5e   : > { %v480_v15 = vmul.f32 0.8, %v476_v14  ;;  %v477_v17 = vld [vmem:[%s1413_s3 + $0x8] sm:$0xff]  ;;  %v483_v22 = vmul.f32 0.8, %v479_v18  ;;  %v956_v23 = vld [vmem:[%s1300_s11 + $0x30] sm:$0xff]  }
  0x5f   : > { %852 = vmatpush3.bf16.msra.mxu0 %v946_v4  ;;  %v481_v21 = vmul.f32 0.8, %v477_v17  ;;  %501 = vperm.xlu1 %942, %v482_v20   ;;  %v957_v24 = vld [vmem:[%s1300_s11 + $0x78] sm:$0xff]   ;;  %v959_v26 = vld [vmem:[%s1410_s0] ss:$8 sps:$4 sm:$0xff]   ;;  %s664_s23 = scalar_lea.sflag [#allocation4], %s1296_s16 }
  0x60   : > { %853 = vmatprep.subr.bf16.mxu0 %v947_v5  ;;  %491 = vperm.xlu0 %941, %v480_v15   ;;  %v958_v25 = vld [vmem:[%s1300_s11 + $0x38] sm:$0xff]   ;;  %s781_s11 = sshll.u32 %s271_s8, 1  ;;  %s1041_s29 = scalar_lea.vmem %s1361_s9, 512 }
  0x61   : > { %v962_v27 = vld [vmem:[%s1410_s0 + $0x14] ss:$8 sps:$4 sm:$0xff]   ;;  %v964_v28 = vld [vmem:[%s1410_s0 + $0x10] ss:$8 sps:$4 sm:$0xff]   ;;  %s273_s28 = scalar_lea.vmem %s1414_s4, %s781_s11  ;;  %p1042_p9 = scmp.ne.s32.totalorder %s1361_s9, %s1041_s29 }
  0x62   : > { %v484_v32 = vld [vmem:[%s273_s28] sm:$0x3]  ;;  %p1435_p10 = scmp.ne.s32.totalorder %s1423_s30, 0  ;;  %s1119_s22 = smov [#allocation7]  }
  0x63   : > { %854 = vmatpush3.bf16.msra.mxu0 %v948_v6  ;;  %506 = vperm.xlu1 %942, %v483_v22   ;;  %v512_v35 = vrot.slane %v484_v32, %v511_v31  ;;  %v534_v36 = vrot.slane %v484_v32, %v533_v33  ;;  %s1045_s7 = sshll.u32 %s1119_s22, 4  ;;  %s1046_s7 = int_to_ptr.vmem [resolvable:$false] %s1045_s7 }
  0x64   : > { %855 = vmatprep.subr.bf16.mxu0 %v949_v7  ;;  %496 = vperm.xlu0 %941, %v481_v21   ;;  %p1043_p1 = pnand %p1042_p9, %p1435_p10  ;;  %s1047_s8 = scalar_lea.vmem %s1046_s7, 1024 }
  0x65   : > { %p1048_p0 = scmp.lt.s32.totalorder %s1361_s9, %s1046_s7  ;;  %p1049_p5 = scmp.lt.s32.totalorder %s1047_s8, %s1041_s29 }
  0x66   : > { %p1044_p4 = pneg %p1043_p1 }
  0x67   : > { %856 = vmatpush3.bf16.msra.mxu0 %v950_v8  ;;  %p1050_p11 = por %p1049_p5, %p1048_p0 }
  0x68   : > { %857 = vmatprep.subr.bf16.mxu0 %v951_v9 }
  0x69   : > { %p1051_p13 = pnand %p1050_p11, %p1044_p4 }
  0x6b   : > { %858 = vmatpush3.bf16.msra.mxu0 %v952_v10 }
  0x6c   : > { %859 = vmatprep.subr.bf16.mxu0 %v953_v11 }
  0x6f   : > { %860 = vmatpush3.bf16.msra.mxu0 %v954_v13 }
  0x70   : > { %861 = vmatprep.subr.bf16.mxu0 %v955_v19 }
  0x73   : > { %862 = vmatpush3.bf16.msra.mxu0 %v956_v23 }
  0x74   : > { %863 = vmatprep.subr.bf16.mxu0 %v957_v24 }
  0x77   : > { %864 = vmatpush3.bf16.msra.mxu0 %v958_v25  ;;  %v965_v25 = vld [vmem:[#allocation5] sm:$0xff]  }
  0x7a   : > { %460 = vmatmul.mubr.bf16.vlgmr.msra.gmra.mrb[0].mxu0 %v959_v26  ;;  %v966_v26 = vld [vmem:[#allocation5 + $0x8] sm:$0xff]  }
  0x7b   : > { %467 = vmatprep.mubr.bf16.mxu0 %v962_v27 }
  0x82   : > { %468 = vmatmul.mubr.bf16.gmra.mrb[4].mxu0 %v964_v28 }
  0xde   : > { %v502_v41 = vpop.permute.xlu1 %501 }
  0xdf   : > { %v492_v34 = vpop.permute.xlu0 %491  ;;  %v515_v48 = vmul.f32 %v512_v35, %v502_v41  ;;  %v537_v49 = vmul.f32 %v534_v36, %v502_v41 }
  0xe0   : > { %v513_v38 = vmul.f32 %v512_v35, %v492_v34  ;;  %v535_v39 = vmul.f32 %v534_v36, %v492_v34 }
  0xe1   : > { %v519_v52 = vsub.f32 1.0, %v515_v48  ;;  %v541_v53 = vsub.f32 1.0, %v537_v49 }
  0xe2   : > { %v517_v43 = vsub.f32 1.0, %v513_v38  ;;  %v539_v44 = vsub.f32 1.0, %v535_v39  ;;  %v507_v47 = vpop.permute.xlu1 %506 }
  0xe3   : > { %v497_v37 = vpop.permute.xlu0 %496  ;;  %v516_v50 = vmul.f32 %v512_v35, %v507_v47  ;;  %v538_v51 = vmul.f32 %v534_v36, %v507_v47 }
  0xe4   : > { %v514_v40 = vmul.f32 %v512_v35, %v497_v37  ;;  %v536_v42 = vmul.f32 %v534_v36, %v497_v37  ;;  %967 = vrcp.f32 %v517_v43 }
  0xe5   : > { %969 = vrcp.f32 %v539_v44  ;;  %v520_v54 = vsub.f32 1.0, %v516_v50  ;;  %v542_v55 = vsub.f32 1.0, %v538_v51 }
  0xe6   : > { %v518_v45 = vsub.f32 1.0, %v514_v40  ;;  %v540_v46 = vsub.f32 1.0, %v536_v42 }
  0xe8   : > { %971 = vrcp.f32 %v518_v45 }
  0xe9   : > { %973 = vrcp.f32 %v540_v46 }
  0xea   : > { %975 = vrcp.f32 %v519_v52 }
  0xeb   : > { %977 = vrcp.f32 %v541_v53 }
  0xec   : > { %979 = vrcp.f32 %v520_v54 }
  0xed   : > { %981 = vrcp.f32 %v542_v55 }
  0xee   : > { %v968_v56 = vpop.eup %967 }
  0xef   : > { %v970_v58 = vpop.eup %969 }
  0xf2   : > { %v972_v60 = vpop.eup %971 }
  0xf3   : > { %v974_v63 = vpop.eup %973 }
  0xf4   : > { %v976_v11 = vpop.eup %975 }
  0xf5   : > { %v978_v14 = vpop.eup %977 }
  0xf6   : > { %v980_v16 = vpop.eup %979 }
  0xf7   : > { %v982_v18 = vpop.eup %981 }
 0x14d   : > { %v865_v57 = vpop.f32.mrb[0].mxu0 }
 0x14e   : > { %v866_v59 = vpop.f32.mrb[1].mxu0 }
 0x14f   : > { %v867_v61 = vadd.f32 %v866_v59, %v865_v57  ;;  %v868_v62 = vpop.f32.mrb[2].mxu0 }
 0x150   : > { %v869_v1 = vpop.f32.mrb[3].mxu0 }
 0x151   : > { %v870_v2 = vadd.f32 %v869_v1, %v868_v62  ;;  %v525_v3 = vmul.f32 %v968_v56, %v867_v61  ;;  %v547_v5 = vmul.f32 %v970_v58, %v867_v61 }
 0x153   : > { %v526_v4 = vmul.f32 %v972_v60, %v870_v2  ;;  %v548_v6 = vmul.f32 %v974_v63, %v870_v2 }
 0x155   : > { %v871_v7 = vpop.f32.mrb[4].mxu0  ;;  %v551_v8 = vpack.c.bf16 %v548_v6, %v547_v5  ;;  %v529_v9 = vpack.c.bf16 %v526_v4, %v525_v3 }
 0x156   : > { %v872_v10 = vpop.f32.mrb[5].mxu0 }
 0x157   : > { %v873_v12 = vadd.f32 %v872_v10, %v871_v7  ;;  %v874_v13 = vpop.f32.mrb[6].mxu0  ;;  %570 = vmatprep.subr.bf16.mxu1 %v551_v8 }
 0x158   : > { %v875_v15 = vpop.f32.mrb[7].mxu0  ;;  %571 = vmatpush1.bf16.msra.mxu1 %v529_v9 }
 0x159   : > { %v876_v17 = vadd.f32 %v875_v15, %v874_v13  ;;  %v527_v19 = vmul.f32 %v976_v11, %v873_v12  ;;  %v549_v20 = vmul.f32 %v978_v14, %v873_v12 }
 0x15b   : > { %v528_v21 = vmul.f32 %v980_v16, %v876_v17  ;;  %v550_v22 = vmul.f32 %v982_v18, %v876_v17 }
 0x15d   : > { %v552_v23 = vpack.c.bf16 %v550_v22, %v549_v20  ;;  %v530_v24 = vpack.c.bf16 %v528_v21, %v527_v19 }
 0x15f   : > { %572 = vmatprep.subr.bf16.mxu1 %v552_v23 }
 0x160   : > { %573 = vmatpush1.bf16.msra.mxu1 %v530_v24 }
 0x163   : > { %804 = vmatmul.mubr.msk.bf16.vlgmr.msra.gmra.mrb[0].mxu1 %vm563_vm0, %v965_v25 }
 0x164   : > { %612 = vmatprep.mubr.bf16.mxu1 %v1118_v0 }
 0x16b   : > { %805 = vmatmul.mubr.msk.bf16.gmra.mrb[4].mxu1 %vm563_vm0, %v966_v26 }
 0x236   : > { %v604_v27 = vpop.f32.mrb[0].mxu1 }
 0x237   : > { %v606_v28 = vpop.f32.mrb[1].mxu1 }
 0x238   : > { %v608_v29 = vpop.f32.mrb[2].mxu1 }
 0x239   : > { %v829_v30 = vpack.c.bf16 %v608_v29, %v604_v27  ;;  %v610_v31 = vpop.f32.mrb[3].mxu1 }
 0x23a   : > { %v839_v32 = vpack.c.bf16 %v610_v31, %v606_v28 }
 0x23b   : > { %830 = vst [vmem:[%s269_s15] sm:$0xff] %v829_v30  }
 0x23c   : > { %847 = vst [vmem:[%s269_s15 + $0x10] sm:$0xff] %v839_v32  }
 0x23e   : > { %v614_v33 = vpop.f32.mrb[4].mxu1 }
 0x23f   : > { %v616_v34 = vpop.f32.mrb[5].mxu1 }
 0x240   : > { %v618_v0 = vpop.f32.mrb[6].mxu1 }
 0x241   : > { %v834_v35 = vpack.c.bf16 %v618_v0, %v614_v33  ;;  %v620_v36 = vpop.f32.mrb[7].mxu1 }
 0x242   : > { %v844_v37 = vpack.c.bf16 %v620_v36, %v616_v34 }
 0x243   : > { %846 = vst [vmem:[%s269_s15 + $0x8] sm:$0xff] %v834_v35  }
 0x244   : > { %848 = vst [vmem:[%s269_s15 + $0x18] sm:$0xff] %v844_v37  }
 0x245   : > { %1054 = shalt.err (!%p1051_p13)
}
 0x246   : > { %s1055_s11 = scalar_lea.hbm %s1366_s17, 512  ;;  %s1059_s28 = scalar_lea.hbm %s1415_s5, 1024 }
 0x247   : > { %p1056_p2 = scmp.ne.s32.totalorder %s1366_s17, %s1055_s11  ;;  %p1060_p3 = scmp.lt.u32.totalorder %s1366_s17, %s1415_s5 }
 0x248   : > { %p1061_p7 = scmp.lt.u32.totalorder %s1059_s28, %s1055_s11  ;;  %p1063_p9 = scmp.lt.u32.totalorder %s1055_s11, %s1366_s17 }
 0x249   : > { %p1057_p6 = pnand %p1056_p2, %p1435_p10 }
 0x24a   : > { %p1062_p8 = por %p1061_p7, %p1060_p3 }
 0x24b   : > { %p1058_p12 = pneg %p1057_p6 }
 0x24c   : > { %p1064_p1 = por %p1063_p9, %p1062_p8 }
 0x24e   : > { %p1065_p4 = pnand %p1064_p1, %p1058_p12 }
 0x250   : > { %1068 = shalt.err (!%p1065_p4)
}
 0x251   : > { %s1120_s26 = smov 64   ;;  %s1121_s12 = smov 128  }
 0x252   : > { %s1122_s13 = smov 4  }
 0x253   : > { %883 = dma.vmem_to_hbm [thread:$0]  (%p1435_p10), %s1361_s9, 512, %s1366_s17, %s664_s23, %s1120_s26, %s1121_s12, %s1122_s13  }
 0x254 PF: > { %s691_s29 = sand.u32 1, %s1099_s18   ;;  %p1436_p0 = scmp.ne.s32.totalorder %s1424_s6, 0 }
 0x255   : > { %p1437_p5 = scmp.ge.s32.totalorder %s1111_s21, 2  ;;  %s692_s22 = scalar_lea.sflag [#allocation4], %s691_s29 }
 0x257   : > { %p894_p11 = pnand %p1437_p5, %p1436_p0 }
 0x259   : > { %1094 = dma.done.wait (!%p894_p11), %s692_s22, 512  }
 0x25a   : > { %1096 = vsyncadd (!%p894_p11), %s692_s22, 4294966784  ;;  %p19_p13 = scmp.ge.s32.totalorder %s1178_s24, 4   ;;  %s1438_s18 = smov %s1103_s19 }
 0x25b   : > { %s1439_s19 = smov %s1107_s20  ;;  %s1440_s20 = smov %s1190_s27 }
 0x25c   : > { %s1441_s21 = smov %s1178_s24  ;;  %21 = sbr.rel (!%p19_p13) target bundleno = 6 (0x6), region = 92 }
 0x263   :  { %697 = vsyncpa [#allocation3], 1 }
 0x264   :  { %699 = vsyncpa [#allocation3 + $0x1], 1 }
 0x265   :  { %700 = vsyncpa [#allocation6], 1 }
 0x266   :  { %701 = vsyncpa [#allocation4], 1 }
 0x267   :  { %703 = vsyncpa [#allocation4 + $0x1], 1 }

</bundles_post_ra>
